<compile_context>
chip_gen: v6e
topology: v6e:2x2x1
jax: 0.10.0
libtpu: 0.0.40
codegen_flags: <defaults>
</compile_context>

<pallas_src>
import functools

import jax
import jax.numpy as jnp
from jax.experimental import pallas as pl
from jax.experimental.pallas import tpu as pltpu

OBS = 2
ACT = 4
HID = 256
OUT_PAD = 128   # lane-padded width of the last-layer weight (MXU-friendly)


# ----------------------------------------------------------------------------
# Kernel
# ----------------------------------------------------------------------------
def dqn_kernel(x_ref,
               w1_ref, b1_ref,
               w2_ref, b2_ref,
               w3_ref, b3_ref,
               w4_ref, b4_ref,
               o_ref, *, bf16_elementwise):
    # ----- Layer 1: in_features = 2 -> VPU broadcast-FMAs, f32. -----
    x = x_ref[...]                                        # (TB, 2) f32
    h = (x[:, 0:1] * w1_ref[0:1, :]
         + x[:, 1:2] * w1_ref[1:2, :]
         + b1_ref[...])                                   # (TB, 256) f32
    h = jnp.maximum(h, 0.0).astype(jnp.bfloat16)

    # ----- Layers 2-3: bf16 operands, f32 MXU accumulation. -----
    for w_ref, b_ref in ((w2_ref, b2_ref), (w3_ref, b3_ref)):
        acc = jnp.dot(h, w_ref[...], preferred_element_type=jnp.float32)
        if bf16_elementwise:
            # v6e/v7x: bias-add + ReLU in bf16 (one accumulator cast, half
            # the VPU elementwise traffic); biases were pre-cast to bf16.
            h = jnp.maximum(acc.astype(jnp.bfloat16) + b_ref[...], 0.0)
        else:
            # v5e path: keep elementwise math in f32, cast only for the MXU.
            h = jnp.maximum(acc + b_ref[...], 0.0).astype(jnp.bfloat16)

    # ----- Layer 4: lane-padded weight for the MXU, narrow f32 store. -----
    out = jnp.dot(h, w4_ref[...], preferred_element_type=jnp.float32)  # (TB, 128)
    o_ref[...] = (out[:, :ACT] + b4_ref[...]).astype(o_ref.dtype)      # (TB, 4)


# ----------------------------------------------------------------------------
# Wrapper
# ----------------------------------------------------------------------------
def _vpu_has_native_bf16():
    """bf16 VALUs exist on v6e/v7x; v5e (and older) have none."""
    try:
        kind = jax.devices()[0].device_kind.lower()
    except Exception:
        return True
    for tag in ("v2", "v3", "v4", "v5"):
        if tag in kind:
            return False
    return True


def prepare_params(params, *, bf16_elementwise=None):
    """One-time weight packing. Call once and cache the result; per-step
    forward cost is then just the pallas_call (no repeated casts/pads)."""
    if bf16_elementwise is None:
        bf16_elementwise = _vpu_has_native_bf16()
    ew_dtype = jnp.bfloat16 if bf16_elementwise else jnp.float32

    (w1, b1), (w2, b2), (w3, b3), (w4, b4) = params
    w1 = w1.astype(jnp.float32)
    b1 = b1.reshape(1, HID).astype(jnp.float32)
    w2 = w2.astype(jnp.bfloat16)
    b2 = b2.reshape(1, HID).astype(ew_dtype)
    w3 = w3.astype(jnp.bfloat16)
    b3 = b3.reshape(1, HID).astype(ew_dtype)
    w4p = jnp.zeros((HID, OUT_PAD), jnp.bfloat16).at[:, :ACT].set(
        w4.astype(jnp.bfloat16))
    b4 = b4.reshape(1, ACT).astype(jnp.float32)
    return (w1, b1, w2, b2, w3, b3, w4p, b4)


def _select_tile(B, block_b):
    """Row-tile TB: multiple of 16 (bf16 MXU LHS), <= block_b, and chosen so
    mid/large batches get >= 2 grid steps (v7x megacore sharding)."""
    tb = -(-B // 2)                     # aim for at least 2 grid steps
    tb = ((tb + 15) // 16) * 16         # bf16 sublane packing: 16-row tiles
    tb = max(16, min(block_b, tb))
    b_pad = ((B + tb - 1) // tb) * tb
    return tb, b_pad


def dqn_forward(x, prepared, *, block_b=512):
    """x: [B, OBS] float32; prepared: output of prepare_params."""
    w1, b1, w2, b2, w3, b3, w4p, b4 = prepared
    bf16_elementwise = (b2.dtype == jnp.bfloat16)   # path encoded in dtypes

    B = x.shape[0]
    TB, B_pad = _select_tile(B, block_b)
    if B_pad != B:
        x = jnp.pad(x, ((0, B_pad - B), (0, 0)))

    const = lambda i: (0, 0)   # weights/biases: same block every grid step
    kernel = functools.partial(dqn_kernel, bf16_elementwise=bf16_elementwise)

    out = pl.pallas_call(
        kernel,
        out_shape=jax.ShapeDtypeStruct((B_pad, ACT), jnp.float32),
        grid=(B_pad // TB,),
        in_specs=[
            pl.BlockSpec((TB, OBS), lambda i: (i, 0)),      # x (tiled rows)
            pl.BlockSpec((OBS, HID), const),                # w1
            pl.BlockSpec((1, HID), const),                  # b1
            pl.BlockSpec((HID, HID), const),                # w2
            pl.BlockSpec((1, HID), const),                  # b2
            pl.BlockSpec((HID, HID), const),                # w3
            pl.BlockSpec((1, HID), const),                  # b3
            pl.BlockSpec((HID, OUT_PAD), const),            # w4 (lane-padded)
            pl.BlockSpec((1, ACT), const),                  # b4
        ],
        out_specs=pl.BlockSpec((TB, ACT), lambda i: (i, 0)),
        compiler_params=pltpu.CompilerParams(
            dimension_semantics=("parallel",)),
    )(x, w1, b1, w2, b2, w3, b3, w4p, b4)

    return out[:B] if B_pad != B else out


# ----------------------------------------------------------------------------
# Init + references
# ----------------------------------------------------------------------------
def init_params(key):
    """Weights ~ N(0, 1) (module re-inits Linear weights with normal_),
    biases keep PyTorch's default Linear init U(-1/sqrt(fan_in), +)."""
    dims = [(OBS, HID), (HID, HID), (HID, HID), (HID, ACT)]
    params = []
    for (fan_in, fan_out) in dims:
        key, kw, kb = jax.random.split(key, 3)
        w = jax.random.normal(kw, (fan_in, fan_out), dtype=jnp.float32)
        bound = 1.0 / jnp.sqrt(jnp.float32(fan_in))
        b = jax.random.uniform(kb, (1, fan_out), dtype=jnp.float32,
                               minval=-bound, maxval=bound)
        params.append((w, b))
    return params


def reference_forward_matched(x, params, *, bf16_elementwise):
    """Pure-JAX reference replicating the kernel's mixed-precision math."""
    (w1, b1), (w2, b2), (w3, b3), (w4, b4) = params
    h = jnp.maximum(x @ w1 + b1.reshape(1, -1), 0.0).astype(jnp.bfloat16)
    for (w, b) in ((w2, b2), (w3, b3)):
        acc = jnp.dot(h, w.astype(jnp.bfloat16),
                      preferred_element_type=jnp.float32)
        if bf16_elementwise:
            h = jnp.maximum(
                acc.astype(jnp.bfloat16) + b.reshape(1, -1).astype(jnp.bfloat16),
                0.0)
        else:
            h = jnp.maximum(acc + b.reshape(1, -1), 0.0).astype(jnp.bfloat16)
    out = jnp.dot(h, w4.astype(jnp.bfloat16),
                  preferred_element_type=jnp.float32)
    return out + b4.reshape(1, -1)


def reference_forward_f32(x, params):
    """Full-f32 reference matching the original PyTorch module."""
    h = x
    for i, (w, b) in enumerate(params):
        h = h @ w + b.reshape(1, -1)
        if i < len(params) - 1:
            h = jnp.maximum(h, 0.0)
    return h


# ----------------------------------------------------------------------------
# Test
# ----------------------------------------------------------------------------
if __name__ == "__main__":
    key = jax.random.PRNGKey(0)
    key, kx1, kx2 = jax.random.split(key, 3)

    params = init_params(key)
    prepared = prepare_params(params)          # one-time packing (cache this)
    bf16_ew = (prepared[3].dtype == jnp.bfloat16)

    fwd = jax.jit(dqn_forward)

    def rel_err(a, b):
        return float(jnp.linalg.norm(a - b) / (jnp.linalg.norm(b) + 1e-6))

    # Small batch (single grid step) and a batch that exercises padding plus
    # a >=2-step grid (megacore path).
    for B, kx in ((8, kx1), (48, kx2)):
        x = jax.random.normal(kx, (B, OBS), dtype=jnp.float32)
        out = jax.block_until_ready(fwd(x, prepared))
        assert out.shape == (B, ACT)

        ref_m = reference_forward_matched(x, params, bf16_elementwise=bf16_ew)
        ref_f = reference_forward_f32(x, params)
        e_m = rel_err(out, ref_m)
        e_f = rel_err(out, ref_f)
        assert e_m < 1e-2, f"B={B}: mismatch vs matched-precision ref ({e_m})"
        assert e_f < 5e-2, f"B={B}: mismatch vs f32 ref ({e_f})"

    print("KERNEL_OK")
</pallas_src>

<mosaic_0001>
module attributes {stable_mosaic.version = 11 : i64} {
  func.func @dqn_kernel(%arg0: i32, %arg1: memref<16x2xf32, #tpu.memory_space<vmem>>, %arg2: memref<2x256xf32, #tpu.memory_space<vmem>>, %arg3: memref<1x256xf32, #tpu.memory_space<vmem>>, %arg4: memref<256x256xbf16, #tpu.memory_space<vmem>>, %arg5: memref<1x256xbf16, #tpu.memory_space<vmem>>, %arg6: memref<256x256xbf16, #tpu.memory_space<vmem>>, %arg7: memref<1x256xbf16, #tpu.memory_space<vmem>>, %arg8: memref<256x128xbf16, #tpu.memory_space<vmem>>, %arg9: memref<1x4xf32, #tpu.memory_space<vmem>>, %arg10: memref<16x4xf32, #tpu.memory_space<vmem>>) attributes {dimension_semantics = [#tpu.dimension_semantics<parallel>], iteration_bounds = array<i64: 1>, scalar_prefetch = 0 : i64, scratch_operands = 0 : i64, tpu.core_type = #tpu.core_type<tc>, window_params = [{transform_indices = @transform_0, window_bounds = array<i64: 16, 2>}, {pipeline_mode = #tpu.pipeline_mode<synchronous>, transform_indices = @transform_1, window_bounds = array<i64: 2, 256>}, {pipeline_mode = #tpu.pipeline_mode<synchronous>, transform_indices = @transform_2, window_bounds = array<i64: 1, 256>}, {pipeline_mode = #tpu.pipeline_mode<synchronous>, transform_indices = @transform_3, window_bounds = array<i64: 256, 256>}, {pipeline_mode = #tpu.pipeline_mode<synchronous>, transform_indices = @transform_4, window_bounds = array<i64: 1, 256>}, {pipeline_mode = #tpu.pipeline_mode<synchronous>, transform_indices = @transform_5, window_bounds = array<i64: 256, 256>}, {pipeline_mode = #tpu.pipeline_mode<synchronous>, transform_indices = @transform_6, window_bounds = array<i64: 1, 256>}, {pipeline_mode = #tpu.pipeline_mode<synchronous>, transform_indices = @transform_7, window_bounds = array<i64: 256, 128>}, {pipeline_mode = #tpu.pipeline_mode<synchronous>, transform_indices = @transform_8, window_bounds = array<i64: 1, 4>}, {transform_indices = @transform_9, window_bounds = array<i64: 16, 4>}]} {
    %c0 = arith.constant 0 : index
    %c0_0 = arith.constant 0 : index
    %0 = vector.load %arg1[%c0, %c0_0] : memref<16x2xf32, #tpu.memory_space<vmem>>, vector<16x2xf32>
    %1 = vector.extract_strided_slice %0 {offsets = [0, 0], sizes = [16, 1], strides = [1, 1]} : vector<16x2xf32> to vector<16x1xf32>
    %c0_1 = arith.constant 0 : index
    %c0_2 = arith.constant 0 : index
    %2 = vector.load %arg2[%c0_1, %c0_2] : memref<2x256xf32, #tpu.memory_space<vmem>>, vector<1x256xf32>
    %3 = vector.broadcast %1 : vector<16x1xf32> to vector<16x256xf32>
    %4 = vector.broadcast %2 : vector<1x256xf32> to vector<16x256xf32>
    %5 = arith.mulf %3, %4 : vector<16x256xf32>
    %6 = vector.extract_strided_slice %0 {offsets = [0, 1], sizes = [16, 1], strides = [1, 1]} : vector<16x2xf32> to vector<16x1xf32>
    %c1 = arith.constant 1 : index
    %c0_3 = arith.constant 0 : index
    %7 = vector.load %arg2[%c1, %c0_3] : memref<2x256xf32, #tpu.memory_space<vmem>>, vector<1x256xf32>
    %8 = vector.broadcast %6 : vector<16x1xf32> to vector<16x256xf32>
    %9 = vector.broadcast %7 : vector<1x256xf32> to vector<16x256xf32>
    %10 = arith.mulf %8, %9 : vector<16x256xf32>
    %11 = arith.addf %5, %10 : vector<16x256xf32>
    %c0_4 = arith.constant 0 : index
    %c0_5 = arith.constant 0 : index
    %12 = vector.load %arg3[%c0_4, %c0_5] : memref<1x256xf32, #tpu.memory_space<vmem>>, vector<1x256xf32>
    %13 = vector.broadcast %12 : vector<1x256xf32> to vector<16x256xf32>
    %14 = arith.addf %11, %13 : vector<16x256xf32>
    %cst = arith.constant 0.000000e+00 : f32
    %15 = vector.broadcast %cst : f32 to vector<16x256xf32>
    %16 = arith.maximumf %14, %15 : vector<16x256xf32>
    %17 = arith.truncf %16 : vector<16x256xf32> to vector<16x256xbf16>
    %c0_6 = arith.constant 0 : index
    %c0_7 = arith.constant 0 : index
    %18 = vector.load %arg4[%c0_6, %c0_7] : memref<256x256xbf16, #tpu.memory_space<vmem>>, vector<256x256xbf16>
    %cst_8 = arith.constant dense<0.000000e+00> : vector<16x256xf32>
    %19 = tpu.matmul %17, %18, %cst_8 {dimension_numbers = #tpu.dot_dimension_numbers<[1], [0], [0], [1], [0, 0, 1, 1], [], []>} : vector<16x256xbf16>, vector<256x256xbf16>, vector<16x256xf32> -> vector<16x256xf32>
    %20 = arith.truncf %19 : vector<16x256xf32> to vector<16x256xbf16>
    %c0_9 = arith.constant 0 : index
    %c0_10 = arith.constant 0 : index
    %21 = vector.load %arg5[%c0_9, %c0_10] : memref<1x256xbf16, #tpu.memory_space<vmem>>, vector<1x256xbf16>
    %22 = vector.broadcast %21 : vector<1x256xbf16> to vector<16x256xbf16>
    %23 = arith.addf %20, %22 : vector<16x256xbf16>
    %cst_11 = arith.constant 0.000000e+00 : bf16
    %24 = vector.broadcast %cst_11 : bf16 to vector<16x256xbf16>
    %25 = arith.maximumf %23, %24 : vector<16x256xbf16>
    %c0_12 = arith.constant 0 : index
    %c0_13 = arith.constant 0 : index
    %26 = vector.load %arg6[%c0_12, %c0_13] : memref<256x256xbf16, #tpu.memory_space<vmem>>, vector<256x256xbf16>
    %cst_14 = arith.constant dense<0.000000e+00> : vector<16x256xf32>
    %27 = tpu.matmul %25, %26, %cst_14 {dimension_numbers = #tpu.dot_dimension_numbers<[1], [0], [0], [1], [0, 0, 1, 1], [], []>} : vector<16x256xbf16>, vector<256x256xbf16>, vector<16x256xf32> -> vector<16x256xf32>
    %28 = arith.truncf %27 : vector<16x256xf32> to vector<16x256xbf16>
    %c0_15 = arith.constant 0 : index
    %c0_16 = arith.constant 0 : index
    %29 = vector.load %arg7[%c0_15, %c0_16] : memref<1x256xbf16, #tpu.memory_space<vmem>>, vector<1x256xbf16>
    %30 = vector.broadcast %29 : vector<1x256xbf16> to vector<16x256xbf16>
    %31 = arith.addf %28, %30 : vector<16x256xbf16>
    %cst_17 = arith.constant 0.000000e+00 : bf16
    %32 = vector.broadcast %cst_17 : bf16 to vector<16x256xbf16>
    %33 = arith.maximumf %31, %32 : vector<16x256xbf16>
    %c0_18 = arith.constant 0 : index
    %c0_19 = arith.constant 0 : index
    %34 = vector.load %arg8[%c0_18, %c0_19] : memref<256x128xbf16, #tpu.memory_space<vmem>>, vector<256x128xbf16>
    %cst_20 = arith.constant dense<0.000000e+00> : vector<16x128xf32>
    %35 = tpu.matmul %33, %34, %cst_20 {dimension_numbers = #tpu.dot_dimension_numbers<[1], [0], [0], [1], [0, 0, 1, 1], [], []>} : vector<16x256xbf16>, vector<256x128xbf16>, vector<16x128xf32> -> vector<16x128xf32>
    %36 = vector.extract_strided_slice %35 {offsets = [0, 0], sizes = [16, 4], strides = [1, 1]} : vector<16x128xf32> to vector<16x4xf32>
    %c0_21 = arith.constant 0 : index
    %c0_22 = arith.constant 0 : index
    %37 = vector.load %arg9[%c0_21, %c0_22] : memref<1x4xf32, #tpu.memory_space<vmem>>, vector<1x4xf32>
    %38 = vector.broadcast %37 : vector<1x4xf32> to vector<16x4xf32>
    %39 = arith.addf %36, %38 : vector<16x4xf32>
    %c0_23 = arith.constant 0 : index
    %c0_24 = arith.constant 0 : index
    %40 = vector.load %arg10[%c0_23, %c0_24] : memref<16x4xf32, #tpu.memory_space<vmem>>, vector<16x4xf32>
    tpu.vector_store %arg10[%c0_23, %c0_24], %39 {strides = array<i32>} : memref<16x4xf32, #tpu.memory_space<vmem>>, vector<16x4xf32>,
    return
  }
  func.func @transform_0(%arg0: i32) -> (i32, i32) {
    %c0_i32 = arith.constant 0 : i32
    %c0_i32_0 = arith.constant 0 : i32
    return %arg0, %c0_i32 : i32, i32
  }
  func.func @transform_1(%arg0: i32) -> (i32, i32) {
    %c0_i32 = arith.constant 0 : i32
    %c0_i32_0 = arith.constant 0 : i32
    %c0_i32_1 = arith.constant 0 : i32
    return %c0_i32, %c0_i32_0 : i32, i32
  }
  func.func @transform_2(%arg0: i32) -> (i32, i32) {
    %c0_i32 = arith.constant 0 : i32
    %c0_i32_0 = arith.constant 0 : i32
    %c0_i32_1 = arith.constant 0 : i32
    return %c0_i32, %c0_i32_0 : i32, i32
  }
  func.func @transform_3(%arg0: i32) -> (i32, i32) {
    %c0_i32 = arith.constant 0 : i32
    %c0_i32_0 = arith.constant 0 : i32
    %c0_i32_1 = arith.constant 0 : i32
    return %c0_i32, %c0_i32_0 : i32, i32
  }
  func.func @transform_4(%arg0: i32) -> (i32, i32) {
    %c0_i32 = arith.constant 0 : i32
    %c0_i32_0 = arith.constant 0 : i32
    %c0_i32_1 = arith.constant 0 : i32
    return %c0_i32, %c0_i32_0 : i32, i32
  }
  func.func @transform_5(%arg0: i32) -> (i32, i32) {
    %c0_i32 = arith.constant 0 : i32
    %c0_i32_0 = arith.constant 0 : i32
    %c0_i32_1 = arith.constant 0 : i32
    return %c0_i32, %c0_i32_0 : i32, i32
  }
  func.func @transform_6(%arg0: i32) -> (i32, i32) {
    %c0_i32 = arith.constant 0 : i32
    %c0_i32_0 = arith.constant 0 : i32
    %c0_i32_1 = arith.constant 0 : i32
    return %c0_i32, %c0_i32_0 : i32, i32
  }
  func.func @transform_7(%arg0: i32) -> (i32, i32) {
    %c0_i32 = arith.constant 0 : i32
    %c0_i32_0 = arith.constant 0 : i32
    %c0_i32_1 = arith.constant 0 : i32
    return %c0_i32, %c0_i32_0 : i32, i32
  }
  func.func @transform_8(%arg0: i32) -> (i32, i32) {
    %c0_i32 = arith.constant 0 : i32
    %c0_i32_0 = arith.constant 0 : i32
    %c0_i32_1 = arith.constant 0 : i32
    return %c0_i32, %c0_i32_0 : i32, i32
  }
  func.func @transform_9(%arg0: i32) -> (i32, i32) {
    %c0_i32 = arith.constant 0 : i32
    %c0_i32_0 = arith.constant 0 : i32
    return %arg0, %c0_i32 : i32, i32
  }
}

</mosaic_0001>

<bundles_post_ra>
// kernel: dqn_forward.1
= control target key start
LH: loop header
LB: loop body
LE: loop exit
PB: predicated region body
PF: predicated region fallthrough
CT: control target
= control target key end

     0   :  { %14 = vsyncpa [#allocation3], 0  ;;  %s1311_s0 = inlined_call_operand.vmem [shape: f32[16,2], index: 0, kind: input, shape index: {}]   ;;  %s1312_s1 = inlined_call_operand.vmem [shape: f32[2,256], index: 1, kind: input, shape index: {}]   ;;  %s1313_s2 = inlined_call_operand.vmem [shape: f32[1,256], index: 2, kind: input, shape index: {}]   ;;  %s1314_s3 = inlined_call_operand.hbm [shape: bf16[256,256], index: 3, kind: input, shape index: {}]   ;;  %s1315_s4 = inlined_call_operand.vmem [shape: bf16[1,256], index: 4, kind: input, shape index: {}]   ;;  %s1316_s5 = inlined_call_operand.hbm [shape: bf16[256,256], index: 5, kind: input, shape index: {}]   ;;  %s1317_s6 = inlined_call_operand.vmem [shape: bf16[1,256], index: 6, kind: input, shape index: {}]   ;;  %s1318_s7 = inlined_call_operand.hbm [shape: bf16[256,128], index: 7, kind: input, shape index: {}]   ;;  %s1319_s8 = inlined_call_operand.vmem [shape: f32[1,4], index: 8, kind: input, shape index: {}]   ;;  %s1320_s9 = inlined_call_operand.vmem [shape: f32[16,4], index: 9, kind: output, shape index: {}]  }
   0x1   :  { %15 = vsyncpa [#allocation5], 0  ;;  %s1193_s30 = smov [#allocation4]   ;;  %s1194_s11 = smov [#allocation2]  }
   0x2   :  { %s41_s10 = sshll.u32 %s1193_s30, 4  ;;  %s27_s12 = sshll.u32 %s1194_s11, 4  ;;  %s42_s10 = int_to_ptr.vmem [resolvable:$true] %s41_s10  ;;  %s28_s12 = int_to_ptr.vmem [resolvable:$true] %s27_s12 }
   0x3   :  { %s1137_s13 = scalar_lea.vmem %s42_s10, 4096  ;;  %p1142_p1 = scmp.lt.s32.totalorder %s42_s10, %s42_s10 }
   0x4   :  { %p1138_p0 = scmp.ne.s32.totalorder %s42_s10, %s1137_s13  ;;  %p1143_p2 = scmp.lt.s32.totalorder %s1137_s13, %s1137_s13 }
   0x6   :  { %p1144_p3 = por %p1143_p2, %p1142_p1 }
   0x8   :  { %p1145_p4 = pnand %p1144_p3, %p1138_p0 }
   0xa   :  { %1148 = shalt.err (!%p1145_p4)
}
   0xb   :  { %s1195_s14 = smov 128   ;;  %s1196_s15 = smov 8  }
   0xc   :  { %47 = dma.hbm_to_vmem [thread:$0]  %s1316_s5, 4096, %s42_s10, [#allocation5], %s1195_s14, %s1195_s14, %s1196_s15  }
   0xd   :  { %s1157_s18 = scalar_lea.vmem %s28_s12, 4096  ;;  %p1162_p6 = scmp.lt.s32.totalorder %s28_s12, %s28_s12 }
   0xe   :  { %p1158_p5 = scmp.ne.s32.totalorder %s28_s12, %s1157_s18  ;;  %p1163_p7 = scmp.lt.s32.totalorder %s1157_s18, %s1157_s18 }
  0x10   :  { %p1164_p8 = por %p1163_p7, %p1162_p6 }
  0x12   :  { %p1165_p9 = pnand %p1164_p8, %p1158_p5 }
  0x14   :  { %1168 = shalt.err (!%p1165_p9)
}
  0x15   :  { %33 = dma.hbm_to_vmem [thread:$0]  %s1314_s3, 4096, %s28_s12, [#allocation3], %s1195_s14, %s1195_s14, %s1196_s15  }
  0x16   :  { %s1197_s21 = smov [#allocation6]  }
  0x17   :  { %s55_s22 = sshll.u32 %s1197_s21, 4  ;;  %s56_s22 = int_to_ptr.vmem [resolvable:$true] %s55_s22 }
  0x18   :  { %s1177_s23 = scalar_lea.vmem %s56_s22, 2048  ;;  %p1182_p11 = scmp.lt.s32.totalorder %s56_s22, %s56_s22 }
  0x19   :  { %p1178_p10 = scmp.ne.s32.totalorder %s56_s22, %s1177_s23  ;;  %p1183_p12 = scmp.lt.s32.totalorder %s1177_s23, %s1177_s23 }
  0x1b   :  { %p1184_p13 = por %p1183_p12, %p1182_p11 }
  0x1d   :  { %p1185_p0 = pnand %p1184_p13, %p1178_p10 }
  0x1f   :  { %1188 = shalt.err (!%p1185_p0)
}
  0x20   :  { %s1198_s5 = smov 64   ;;  %s1199_s24 = smov 4  }
  0x21   :  { %61 = dma.hbm_to_vmem [thread:$0]  %s1318_s7, 2048, %s56_s22, [#allocation5], %s1198_s5, %s1198_s5, %s1199_s24  }
  0x22   :  { %1189 = dma.done.wait [#allocation3], 4096  }
  0x23   :  { %1190 = vsyncadd [#allocation3], 4294963200 }
  0x24   :  { %1191 = dma.done.wait [#allocation5], 6144  }
  0x25   :  { %1192 = vsyncadd [#allocation5], 4294961152  ;;  %v1200_v0 = vmov 1   ;;  %v1201_v1 = vmov 0   ;;  %v74_v2 = vld [vmem:[%s1311_s0] sm:$0xff]  ;;  %v75_v3 = vld [vmem:[%s1311_s0 + $0x8] sm:$0xff]  ;;  %v88_v62 = vlaneseq }
  0x26   :  { %1015 = vset.pattern.permute.xlu1 %v1200_v0  ;;  %1014 = vset.pattern.permute.xlu0 %v1201_v1  ;;  %v1017_v4 = vld [vmem:[#allocation2 + $0x74] ss:$8 sps:$4 sm:$0xff]   ;;  %v1019_v5 = vld [vmem:[#allocation2 + $0x70] ss:$8 sps:$4 sm:$0xff]   ;;  %v1020_v6 = vld [vmem:[#allocation2 + $0x64] ss:$8 sps:$4 sm:$0xff]  }
  0x27   :  { %105 = vperm.xlu1 %1015, %v74_v2   ;;  %79 = vperm.xlu0 %1014, %v74_v2   ;;  %v1022_v7 = vld [vmem:[#allocation2 + $0x60] ss:$8 sps:$4 sm:$0xff]   ;;  %v1023_v8 = vld [vmem:[#allocation2 + $0x54] ss:$8 sps:$4 sm:$0xff]   ;;  %v1025_v9 = vld [vmem:[#allocation2 + $0x50] ss:$8 sps:$4 sm:$0xff]  }
  0x28   :  { %345 = vmatprep.subr.bf16.mxu0 %v1017_v4  ;;  %v1026_v10 = vld [vmem:[#allocation2 + $0x44] ss:$8 sps:$4 sm:$0xff]   ;;  %v1028_v11 = vld [vmem:[#allocation2 + $0x40] ss:$8 sps:$4 sm:$0xff]   ;;  %v1029_v12 = vld [vmem:[#allocation2 + $0x34] ss:$8 sps:$4 sm:$0xff]  }
  0x29   :  { %346 = vmatpush1.bf16.msra.mxu0 %v1019_v5  ;;  %v1031_v13 = vld [vmem:[#allocation2 + $0x30] ss:$8 sps:$4 sm:$0xff]   ;;  %v1032_v14 = vld [vmem:[#allocation2 + $0x24] ss:$8 sps:$4 sm:$0xff]   ;;  %v1034_v15 = vld [vmem:[#allocation2 + $0x20] ss:$8 sps:$4 sm:$0xff]  }
  0x2a   :  { %347 = vmatprep.subr.bf16.mxu0 %v1020_v6  ;;  %v1035_v16 = vld [vmem:[#allocation2 + $0x14] ss:$8 sps:$4 sm:$0xff]   ;;  %v1037_v17 = vld [vmem:[#allocation2 + $0x10] ss:$8 sps:$4 sm:$0xff]   ;;  %v1038_v20 = vld [vmem:[#allocation2 + $0x4] ss:$8 sps:$4 sm:$0xff]  }
  0x2b   :  { %109 = vperm.xlu1 %1015, %v75_v3   ;;  %84 = vperm.xlu0 %1014, %v75_v3   ;;  %v1065_v18 = vld [vmem:[#allocation4 + $0x74] ss:$8 sps:$4 sm:$0xff]   ;;  %v1067_v19 = vld [vmem:[#allocation4 + $0x70] ss:$8 sps:$4 sm:$0xff]   ;;  %v1068_v21 = vld [vmem:[#allocation4 + $0x64] ss:$8 sps:$4 sm:$0xff]  }
  0x2c   :  { %624 = vmatprep.subr.bf16.mxu1 %v1065_v18  ;;  %v1070_v22 = vld [vmem:[#allocation4 + $0x60] ss:$8 sps:$4 sm:$0xff]   ;;  %v1071_v23 = vld [vmem:[#allocation4 + $0x54] ss:$8 sps:$4 sm:$0xff]   ;;  %v1073_v26 = vld [vmem:[#allocation4 + $0x50] ss:$8 sps:$4 sm:$0xff]  }
  0x2d   :  { %348 = vmatpush1.bf16.msra.mxu0 %v1022_v7  ;;  %625 = vmatpush1.bf16.msra.mxu1 %v1067_v19  ;;  %v1040_v24 = vld [vmem:[#allocation2] ss:$8 sps:$4 sm:$0xff]   ;;  %v1041_v25 = vld [vmem:[#allocation2 + $0xf4] ss:$8 sps:$4 sm:$0xff]   ;;  %v1074_v27 = vld [vmem:[#allocation4 + $0x44] ss:$8 sps:$4 sm:$0xff]  }
  0x2e   :  { %349 = vmatprep.subr.bf16.mxu0 %v1023_v8  ;;  %626 = vmatprep.subr.bf16.mxu1 %v1068_v21  ;;  %v1043_v28 = vld [vmem:[#allocation2 + $0xf0] ss:$8 sps:$4 sm:$0xff]   ;;  %v1044_v29 = vld [vmem:[#allocation2 + $0xe4] ss:$8 sps:$4 sm:$0xff]   ;;  %v1076_v30 = vld [vmem:[#allocation4 + $0x40] ss:$8 sps:$4 sm:$0xff]  }
  0x2f   :  { %1016 = vset.pattern.permute.xlu0 %v1200_v0  ;;  %v1077_v31 = vld [vmem:[#allocation4 + $0x34] ss:$8 sps:$4 sm:$0xff]   ;;  %v1046_v32 = vld [vmem:[#allocation2 + $0xe0] ss:$8 sps:$4 sm:$0xff]   ;;  %v1049_v34 = vld [vmem:[#allocation2 + $0xd0] ss:$8 sps:$4 sm:$0xff]  }
  0x30   :  { %v1047_v33 = vld [vmem:[#allocation2 + $0xd4] ss:$8 sps:$4 sm:$0xff]   ;;  %v1079_v35 = vld [vmem:[#allocation4 + $0x30] ss:$8 sps:$4 sm:$0xff]   ;;  %v1050_v36 = vld [vmem:[#allocation2 + $0xc4] ss:$8 sps:$4 sm:$0xff]  }
  0x31   :  { %350 = vmatpush1.bf16.msra.mxu0 %v1025_v9  ;;  %627 = vmatpush1.bf16.msra.mxu1 %v1070_v22  ;;  %v1080_v37 = vld [vmem:[#allocation4 + $0x24] ss:$8 sps:$4 sm:$0xff]   ;;  %v1082_v38 = vld [vmem:[#allocation4 + $0x20] ss:$8 sps:$4 sm:$0xff]   ;;  %v1083_v39 = vld [vmem:[#allocation4 + $0x14] ss:$8 sps:$4 sm:$0xff]  }
  0x32   :  { %351 = vmatprep.subr.bf16.mxu0 %v1026_v10  ;;  %628 = vmatprep.subr.bf16.mxu1 %v1071_v23  ;;  %v1052_v40 = vld [vmem:[#allocation2 + $0xc0] ss:$8 sps:$4 sm:$0xff]   ;;  %v1053_v41 = vld [vmem:[#allocation2 + $0xb4] ss:$8 sps:$4 sm:$0xff]   ;;  %v1085_v42 = vld [vmem:[#allocation4 + $0x10] ss:$8 sps:$4 sm:$0xff]  }
  0x33   :  { %v1086_v43 = vld [vmem:[#allocation4 + $0x4] ss:$8 sps:$4 sm:$0xff]   ;;  %v1055_v44 = vld [vmem:[#allocation2 + $0xb0] ss:$8 sps:$4 sm:$0xff]   ;;  %v1088_v46 = vld [vmem:[#allocation4] ss:$8 sps:$4 sm:$0xff]  }
  0x34   :  { %v1056_v45 = vld [vmem:[#allocation2 + $0xa4] ss:$8 sps:$4 sm:$0xff]   ;;  %v1089_v47 = vld [vmem:[#allocation4 + $0xf4] ss:$8 sps:$4 sm:$0xff]   ;;  %v1058_v48 = vld [vmem:[#allocation2 + $0xa0] ss:$8 sps:$4 sm:$0xff]  }
  0x35   :  { %352 = vmatpush1.bf16.msra.mxu0 %v1028_v11  ;;  %629 = vmatpush1.bf16.msra.mxu1 %v1073_v26  ;;  %v1059_v49 = vld [vmem:[#allocation2 + $0x94] ss:$8 sps:$4 sm:$0xff]   ;;  %v1091_v50 = vld [vmem:[#allocation4 + $0xf0] ss:$8 sps:$4 sm:$0xff]   ;;  %v1092_v51 = vld [vmem:[#allocation4 + $0xe4] ss:$8 sps:$4 sm:$0xff]  }
  0x36   :  { %353 = vmatprep.subr.bf16.mxu0 %v1029_v12  ;;  %630 = vmatprep.subr.bf16.mxu1 %v1074_v27  ;;  %v1061_v52 = vld [vmem:[#allocation2 + $0x90] ss:$8 sps:$4 sm:$0xff]   ;;  %v1062_v53 = vld [vmem:[#allocation2 + $0x84] ss:$8 sps:$4 sm:$0xff]   ;;  %v1094_v54 = vld [vmem:[#allocation4 + $0xe0] ss:$8 sps:$4 sm:$0xff]  }
  0x37   :  { %v1095_v55 = vld [vmem:[#allocation4 + $0xd4] ss:$8 sps:$4 sm:$0xff]   ;;  %v1064_v56 = vld [vmem:[#allocation2 + $0x80] ss:$8 sps:$4 sm:$0xff]   ;;  %v1097_v57 = vld [vmem:[#allocation4 + $0xd0] ss:$8 sps:$4 sm:$0xff]  }
  0x38   :  { %v1098_v58 = vld [vmem:[#allocation4 + $0xc4] ss:$8 sps:$4 sm:$0xff]   ;;  %v1100_v59 = vld [vmem:[#allocation4 + $0xc0] ss:$8 sps:$4 sm:$0xff]   ;;  %v1101_v60 = vld [vmem:[#allocation4 + $0xb4] ss:$8 sps:$4 sm:$0xff]  }
  0x39   :  { %354 = vmatpush1.bf16.msra.mxu0 %v1031_v13  ;;  %631 = vmatpush1.bf16.msra.mxu1 %v1076_v30  ;;  %v1103_v61 = vld [vmem:[#allocation4 + $0xb0] ss:$8 sps:$4 sm:$0xff]   ;;  %v1269_v63 = vshrl.u32 %v88_v62, 7  ;;  %v898_v3 = vld [vmem:[%s1312_s1 + $0x1] ss:$2 sm:$0x3] }
  0x3a   :  { %355 = vmatprep.subr.bf16.mxu0 %v1032_v14  ;;  %632 = vmatprep.subr.bf16.mxu1 %v1077_v31  ;;  %v76_v4 = vld [vmem:[%s1312_s1] ss:$2 sm:$0x3]  ;;  %vm889_vm0 = vcmask 31744  }
  0x3b   :  { %v1272_v0 = vsub.s32 0, %v1269_v63  ;;  %v94_v2 = vsub.s32 1, %v1269_v63  ;;  %v131_v11 = vld [vmem:[%s1313_s2] sm:$0x3] }
  0x3d   :  { %356 = vmatpush1.bf16.msra.mxu0 %v1034_v15  ;;  %633 = vmatpush1.bf16.msra.mxu1 %v1079_v35  ;;  %v116_v5 = vrot.slane %v898_v3, %v1272_v0  ;;  %v120_v6 = vrot.slane %v898_v3, %v94_v2  ;;  %v91_v7 = vrot.slane %v76_v4, %v1272_v0 }
  0x3e   :  { %357 = vmatprep.subr.bf16.mxu0 %v1035_v16  ;;  %634 = vmatprep.subr.bf16.mxu1 %v1080_v37  ;;  %v95_v8 = vrot.slane %v76_v4, %v94_v2  ;;  %v136_v18 = vrot.slane %v131_v11, %v1272_v0  ;;  %v140_v19 = vrot.slane %v131_v11, %v94_v2 }
  0x41   :  { %358 = vmatpush1.bf16.msra.mxu0 %v1037_v17  ;;  %635 = vmatpush1.bf16.msra.mxu1 %v1082_v38  ;;  %v1104_v38 = vld [vmem:[#allocation4 + $0xa4] ss:$8 sps:$4 sm:$0xff]  }
  0x42   :  { %359 = vmatprep.subr.bf16.mxu0 %v1038_v20  ;;  %636 = vmatprep.subr.bf16.mxu1 %v1083_v39  ;;  %v1106_v39 = vld [vmem:[#allocation4 + $0xa0] ss:$8 sps:$4 sm:$0xff]  }
  0x45   :  { %360 = vmatpush1.bf16.msra.mxu0 %v1040_v24  ;;  %637 = vmatpush1.bf16.msra.mxu1 %v1085_v42  ;;  %v1110_v42 = vld [vmem:[#allocation4 + $0x84] ss:$8 sps:$4 sm:$0xff]  }
  0x46   :  { %361 = vmatprep.subr.bf16.mxu0 %v1041_v25  ;;  %638 = vmatprep.subr.bf16.mxu1 %v1086_v43  ;;  %v1112_v43 = vld [vmem:[#allocation4 + $0x80] ss:$8 sps:$4 sm:$0xff]  }
  0x49   :  { %362 = vmatpush2.bf16.msra.mxu0 %v1043_v28  ;;  %639 = vmatpush1.bf16.msra.mxu1 %v1088_v46  ;;  %v1115_v46 = vld [vmem:[#allocation6 + $0x70] sm:$0xff]  }
  0x4a   :  { %363 = vmatprep.subr.bf16.mxu0 %v1044_v29  ;;  %640 = vmatprep.subr.bf16.mxu1 %v1089_v47  ;;  %v1116_v47 = vld [vmem:[#allocation6 + $0x30] sm:$0xff]  }
  0x4d   :  { %364 = vmatpush2.bf16.msra.mxu0 %v1046_v32  ;;  %641 = vmatpush2.bf16.msra.mxu1 %v1091_v50  ;;  %v1119_v50 = vld [vmem:[#allocation6 + $0x60] sm:$0xff]  }
  0x4e   :  { %365 = vmatprep.subr.bf16.mxu0 %v1047_v33  ;;  %642 = vmatprep.subr.bf16.mxu1 %v1092_v51  ;;  %v1120_v51 = vld [vmem:[#allocation6 + $0x20] sm:$0xff]  }
  0x51   :  { %366 = vmatpush2.bf16.msra.mxu0 %v1049_v34  ;;  %643 = vmatpush2.bf16.msra.mxu1 %v1094_v54  ;;  %v1202_v54 = vmov 1966171168  }
  0x52   :  { %367 = vmatprep.subr.bf16.mxu0 %v1050_v36  ;;  %644 = vmatprep.subr.bf16.mxu1 %v1095_v55  ;;  %v401_v55 = vunpack.c.l.s4 %v1202_v54 }
  0x55   :  { %368 = vmatpush2.bf16.msra.mxu0 %v1052_v40  ;;  %645 = vmatpush2.bf16.msra.mxu1 %v1097_v57  ;;  %v1107_v40 = vld [vmem:[#allocation4 + $0x94] ss:$8 sps:$4 sm:$0xff]   ;;  %v931_v57 = vld.sshfl [vmem:[%s1315_s4] sm:$0x11 pattern:$0x75316420] }
  0x56   :  { %369 = vmatprep.subr.bf16.mxu0 %v1053_v41  ;;  %646 = vmatprep.subr.bf16.mxu1 %v1098_v58  ;;  %v1109_v41 = vld [vmem:[#allocation4 + $0x90] ss:$8 sps:$4 sm:$0xff]  }
  0x59   :  { %370 = vmatpush2.bf16.msra.mxu0 %v1055_v44  ;;  %647 = vmatpush2.bf16.msra.mxu1 %v1100_v59  ;;  %v1113_v44 = vld [vmem:[#allocation6 + $0x78] sm:$0xff]   ;;  %v399_v59 = vcombine.high %v931_v57, %v931_v57 }
  0x5a   :  { %371 = vmatprep.subr.bf16.mxu0 %v1056_v45  ;;  %648 = vmatprep.subr.bf16.mxu1 %v1101_v60  ;;  %v1114_v45 = vld [vmem:[#allocation6 + $0x38] sm:$0xff]  }
  0x5d   :  { %372 = vmatpush2.bf16.msra.mxu0 %v1058_v48  ;;  %649 = vmatpush2.bf16.msra.mxu1 %v1103_v61  ;;  %v1117_v48 = vld [vmem:[#allocation6 + $0x68] sm:$0xff]  }
  0x5e   :  { %373 = vmatprep.subr.bf16.mxu0 %v1059_v49  ;;  %650 = vmatprep.subr.bf16.mxu1 %v1104_v38  ;;  %v1118_v49 = vld [vmem:[#allocation6 + $0x28] sm:$0xff]  }
  0x61   :  { %374 = vmatpush2.bf16.msra.mxu0 %v1061_v52  ;;  %651 = vmatpush2.bf16.msra.mxu1 %v1106_v39  ;;  %v1121_v52 = vld [vmem:[#allocation6 + $0x58] sm:$0xff]  }
  0x62   :  { %375 = vmatprep.subr.bf16.mxu0 %v1062_v53  ;;  %652 = vmatprep.subr.bf16.mxu1 %v1107_v40  ;;  %v1122_v53 = vld [vmem:[#allocation6 + $0x18] sm:$0xff]   ;;  %v981_v40 = vld [vmem:[%s1319_s8] ss:$0 sm:$0xff] }
  0x65   :  { %376 = vmatpush2.bf16.msra.mxu0 %v1064_v56  ;;  %653 = vmatpush2.bf16.msra.mxu1 %v1109_v41  ;;  %v402_v56 = vunpack.c.0.s8 %v401_v55 }
  0x66   :  { %654 = vmatprep.subr.bf16.mxu1 %v1110_v42  ;;  %982 = vmatprep.subr.bf16.mxu0 %v1113_v44 }
  0x67   :  { %v405_v58 = vsub.s32 %v402_v56, %v1269_v63 }
  0x69   :  { %655 = vmatpush2.bf16.msra.mxu1 %v1112_v43  ;;  %v406_v60 = vrot.slane %v931_v57, %v405_v58  ;;  %v413_v61 = vrot.slane %v399_v59, %v405_v58 }
  0x6b   :  { %v415_v2 = vpack.i.b16 %v406_v60, %v406_v60  ;;  %v422_v3 = vpack.i.b16 %v413_v61, %v413_v61 }
  0xa2   :  { %v106_v9 = vpop.permute.xlu1 %105  ;;  %v80_v10 = vpop.permute.xlu0 %79 }
  0xa3   :  { %v123_v12 = vmul.f32 %v116_v5, %v106_v9  ;;  %v124_v13 = vmul.f32 %v120_v6, %v106_v9  ;;  %v98_v14 = vmul.f32 %v91_v7, %v80_v10  ;;  %v99_v15 = vmul.f32 %v95_v8, %v80_v10 }
  0xa5   :  { %v127_v16 = vadd.f32 %v123_v12, %v98_v14  ;;  %v128_v17 = vadd.f32 %v124_v13, %v99_v15  ;;  %v1123_v14 = vld [vmem:[#allocation6 + $0x50] sm:$0xff]  }
  0xa6   :  { %v110_v20 = vpop.permute.xlu1 %109  ;;  %v85_v21 = vpop.permute.xlu0 %84  ;;  %v1124_v15 = vld [vmem:[#allocation6 + $0x10] sm:$0xff]  }
  0xa7   :  { %v125_v22 = vmul.f32 %v116_v5, %v110_v20  ;;  %v126_v23 = vmul.f32 %v120_v6, %v110_v20  ;;  %v100_v24 = vmul.f32 %v91_v7, %v85_v21  ;;  %v101_v25 = vmul.f32 %v95_v8, %v85_v21  ;;  %v964_v20 = vld.sshfl [vmem:[%s1317_s6] sm:$0x11 pattern:$0x75316420] }
  0xa8   :  { %v144_v28 = vadd.f32 %v140_v19, %v128_v17  ;;  %v143_v29 = vadd.f32 %v136_v18, %v127_v16  ;;  %v420_v6 = vrot.slane %v415_v2, %v1272_v0  ;;  %v427_v8 = vrot.slane %v422_v3, %v1272_v0  ;;  %v1125_v16 = vld [vmem:[#allocation6 + $0x48] sm:$0xff]  }
  0xa9   :  { %v129_v26 = vadd.f32 %v125_v22, %v100_v24  ;;  %v130_v27 = vadd.f32 %v126_v23, %v101_v25  ;;  %v1126_v17 = vld [vmem:[#allocation6 + $0x8] sm:$0xff]   ;;  %v678_v21 = vcombine.high %v964_v20, %v964_v20  ;;  %v685_v22 = vrot.slane %v964_v20, %v405_v58 }
  0xaa   :  { %v148_v33 = vmax.f32 %v144_v28, 0.0  ;;  %v147_v35 = vmax.f32 %v143_v29, 0.0 }
  0xab   :  { %v145_v30 = vadd.f32 %v136_v18, %v129_v26  ;;  %v146_v31 = vadd.f32 %v140_v19, %v130_v27  ;;  %v1127_v18 = vld [vmem:[#allocation6 + $0x40] sm:$0xff]   ;;  %v692_v23 = vrot.slane %v678_v21, %v405_v58  ;;  %v694_v25 = vpack.i.b16 %v685_v22, %v685_v22 }
  0xac   :  { %v1128_v19 = vld [vmem:[#allocation6] sm:$0xff]  }
  0xad   :  { %v149_v32 = vmax.f32 %v145_v30, 0.0  ;;  %v150_v34 = vmax.f32 %v146_v31, 0.0  ;;  %v701_v26 = vpack.i.b16 %v692_v23, %v692_v23  ;;  %v699_v29 = vrot.slane %v694_v25, %v1272_v0 }
  0xaf   :  { %v152_v36 = vpack.c.bf16 %v150_v34, %v148_v33  ;;  %v151_v37 = vpack.c.bf16 %v149_v32, %v147_v35  ;;  %v706_v31 = vrot.slane %v701_v26, %v1272_v0 }
  0xb1   :  { %377 = vmatprep.mubr.bf16.mxu0 %v152_v36 }
  0xb2   :  { %378 = vmatmul.mubr.bf16.vlgmr.msra.gmra.mxu0 %v151_v37 }
  0xb3   :  { %983 = vmatpush3.bf16.msra.mxu0 %v1114_v45 }
  0xb4   :  { %984 = vmatprep.subr.bf16.mxu0 %v1115_v46 }
  0xb7   :  { %985 = vmatpush3.bf16.msra.mxu0 %v1116_v47 }
  0xb8   :  { %986 = vmatprep.subr.bf16.mxu0 %v1117_v48 }
  0xbb   :  { %987 = vmatpush3.bf16.msra.mxu0 %v1118_v49 }
  0xbc   :  { %988 = vmatprep.subr.bf16.mxu0 %v1119_v50 }
  0xbf   :  { %989 = vmatpush3.bf16.msra.mxu0 %v1120_v51 }
  0xc0   :  { %990 = vmatprep.subr.bf16.mxu0 %v1121_v52 }
  0xc3   :  { %991 = vmatpush3.bf16.msra.mxu0 %v1122_v53 }
  0xc4   :  { %992 = vmatprep.subr.bf16.mxu0 %v1123_v14 }
  0xc7   :  { %993 = vmatpush3.bf16.msra.mxu0 %v1124_v15 }
  0xc8   :  { %994 = vmatprep.subr.bf16.mxu0 %v1125_v16 }
  0xcb   :  { %995 = vmatpush3.bf16.msra.mxu0 %v1126_v17 }
  0xcc   :  { %996 = vmatprep.subr.bf16.mxu0 %v1127_v18 }
  0xcf   :  { %997 = vmatpush3.bf16.msra.mxu0 %v1128_v19 }
 0x172   :  { %v379_v62 = vpop.f32.mrf.mxu0 }
 0x174   :  { %v381_v4 = vpop.f32.mrf.mxu0 }
 0x176   :  { %v383_v5 = vpop.f32.mrf.mxu0 }
 0x177   :  { %v388_v7 = vpack.c.bf16 %v383_v5, %v379_v62 }
 0x178   :  { %v385_v9 = vpop.f32.mrf.mxu0 }
 0x179   :  { %v389_v10 = vpack.c.bf16 %v385_v9, %v381_v4  ;;  %v428_v11 = vadd.bf16 %v420_v6, %v388_v7 }
 0x17b   :  { %v429_v12 = vadd.bf16 %v427_v8, %v389_v10  ;;  %v430_v63 = vmax.bf16 %v1201_v1, %v428_v11 }
 0x17d   :  { %v431_v13 = vmax.bf16 %v1201_v1, %v429_v12 }
 0x17f   :  { %656 = vmatprep.mubr.bf16.mxu1 %v431_v13 }
 0x180   :  { %657 = vmatmul.mubr.bf16.vlgmr.msra.gmra.mxu1 %v430_v63 }
 0x240   :  { %v658_v24 = vpop.f32.mrf.mxu1 }
 0x242   :  { %v660_v27 = vpop.f32.mrf.mxu1 }
 0x244   :  { %v662_v28 = vpop.f32.mrf.mxu1 }
 0x245   :  { %v667_v30 = vpack.c.bf16 %v662_v28, %v658_v24 }
 0x246   :  { %v664_v32 = vpop.f32.mrf.mxu1 }
 0x247   :  { %v668_v33 = vpack.c.bf16 %v664_v32, %v660_v27  ;;  %v707_v34 = vadd.bf16 %v699_v29, %v667_v30 }
 0x249   :  { %v708_v35 = vadd.bf16 %v706_v31, %v668_v33  ;;  %v709_v37 = vmax.bf16 %v1201_v1, %v707_v34 }
 0x24b   :  { %v710_v36 = vmax.bf16 %v1201_v1, %v708_v35 }
 0x24d   :  { %871 = vmatprep.mubr.bf16.mxu0 %v710_v36 }
 0x24e   :  { %872 = vmatmul.mubr.bf16.vlgmr.msra.gmra.mxu0 %v709_v37 }
 0x30e   :  { %v998_v38 = vpop.f32.mrf.mxu0 }
 0x310   :  { %v999_v39 = vpop.f32.mrf.mxu0 }
 0x311   :  { %v1000_v41 = vadd.f32 %v999_v39, %v998_v38 }
 0x312   :  { %v1001_v42 = vpop.f32.mrf.mxu0 }
 0x313   :  { %v887_v0 = vadd.f32 %v1000_v41, %v981_v40 }
 0x314   :  { %v1002_v43 = vpop.f32.mrf.mxu0 }
 0x315   :  { %890 = vst.msk [vmem:[%s1320_s9] sm:$0xff] %vm889_vm0, %v887_v0  ;;  %v1003_v44 = vadd.f32 %v1002_v43, %v1001_v42 }
 0x317   :  { %v888_v45 = vadd.f32 %v1003_v44, %v981_v40 }
 0x319   :  { %891 = vst.msk [vmem:[%s1320_s9 + $0x8] sm:$0xff] %vm889_vm0, %v888_v45 }
 0x31a   :  { %896 = vsyncpa [#allocation3], 1 }
 0x31b   :  { %897 = vsyncpa [#allocation5], 1 }

</bundles_post_ra>
